<compile_context>
chip_gen: v5e
topology: v5e:2x2
jax: 0.10.0
libtpu: 0.0.40
codegen_flags: <defaults>
</compile_context>

<pallas_src>
import math

import jax
import jax.numpy as jnp
from jax.experimental import pallas as pl
from jax.experimental.pallas import tpu as pltpu


def _round_up(v, m):
    return (v + m - 1) // m * m


def _vmem_capacity_bytes():
    try:
        return int(pltpu.get_tpu_info().vmem_capacity_bytes)
    except Exception:
        return 64 * 1024 * 1024  # conservative: v7x per-TensorCore VMEM


def _choose_time_tile(T, cin, cout, bytes_per_el, vmem_bytes):
    """Largest multiple-of-128 time tile whose double-buffered x/out columns
    (plus the f32 in-kernel partial products) fit the per-chip budget."""
    if vmem_bytes >= 100 * 1024 * 1024:       # v5e / v6e: 128 MiB VMEM
        budget, cap = 32 * 1024 * 1024, 16384
    else:                                     # v7x: 64 MiB per TensorCore
        budget, cap = 14 * 1024 * 1024, 8192
    # per time-column bytes: x + out (double-buffered) + y0/y1/out f32 temps.
    per_col = 2 * (cin + cout) * bytes_per_el + 3 * cout * 4
    t_tile = (budget // per_col) // 128 * 128
    return max(128, min(t_tile, cap, _round_up(T, 128)))


def _causal_conv1d_kernel(x_ref, w_ref, o_ref, carry_ref):
    # x_ref    : (1, Cin, T_TILE)   current batch element / time tile (NCT)
    # w_ref    : (2, Cout, Cin)     resident weights; w_ref[k] = tap-k matrix
    # o_ref    : (1, Cout, T_TILE)
    # carry_ref: (Cout, 1) f32      last column of previous tile's W0 @ x
    t_idx = pl.program_id(1)

    @pl.when(t_idx == 0)
    def _():
        # First time tile of this batch element: x[:, :, -1] := 0.
        carry_ref[...] = jnp.zeros_like(carry_ref)

    x = x_ref[0]                                               # (Cin, T_TILE)
    y0 = jnp.dot(w_ref[0], x, preferred_element_type=jnp.float32)
    y1 = jnp.dot(w_ref[1], x, preferred_element_type=jnp.float32)

    prev = carry_ref[...]              # read carry before overwriting it
    carry_ref[...] = y0[:, -1:]

    # Causal shift of the tap-0 partial output along the lane (time) axis via
    # the XLU, then patch lane 0 with the carried column: one narrow store
    # instead of a full-tile iota + where.
    out = y1 + pltpu.roll(y0, shift=1, axis=1)
    o_ref[0] = out.astype(o_ref.dtype)
    o_ref[0, :, 0:1] = (y1[:, 0:1] + prev).astype(o_ref.dtype)


def causal_conv1d(x_nct, weight, *, t_tile=None):
    """x_nct: (N, Cin, T); weight: (Cout, Cin, 2) -> (N, Cout, T).

    Pass bf16 `x_nct` for bf16 I/O with f32 accumulation (halves HBM traffic).
    """
    N, Cin, T = x_nct.shape
    Cout = weight.shape[0]
    dtype = x_nct.dtype
    bytes_per_el = jnp.dtype(dtype).itemsize

    vmem_bytes = _vmem_capacity_bytes()
    if t_tile is None:
        t_tile = _choose_time_tile(T, Cin, Cout, bytes_per_el, vmem_bytes)
    grid = (N, pl.cdiv(T, t_tile))

    # (Cout, Cin, 2) -> (2, Cout, Cin): tiny array, resident for the whole
    # kernel (constant index_map -> fetched once).
    # TODO(synk): pipeline_mode=pl.Buffered(1) on this spec would drop its
    # redundant second VMEM buffer once single-buffered pipeline_mode is
    # confirmed on the deployed jax version.
    w = jnp.moveaxis(weight, 2, 0).astype(dtype)

    def run(batch_sem):
        return pl.pallas_call(
            _causal_conv1d_kernel,
            out_shape=jax.ShapeDtypeStruct((N, Cout, T), dtype),
            grid_spec=pltpu.PrefetchScalarGridSpec(
                num_scalar_prefetch=0,
                grid=grid,
                in_specs=[
                    # TODO(synk): bump to pipeline_mode=pl.Buffered(3) if the
                    # xprof trace still shows exposed input DMA.
                    pl.BlockSpec((1, Cin, t_tile), lambda n, t: (n, 0, t)),
                    pl.BlockSpec((2, Cout, Cin), lambda n, t: (0, 0, 0)),
                ],
                out_specs=pl.BlockSpec((1, Cout, t_tile), lambda n, t: (n, 0, t)),
                scratch_shapes=[pltpu.VMEM((Cout, 1), jnp.float32)],
            ),
            compiler_params=pltpu.CompilerParams(
                # Time axis is sequential (carries one column of history) and
                # last; batch axis is independent across cores.
                dimension_semantics=(batch_sem, pltpu.ARBITRARY),
                vmem_limit_bytes=min(vmem_bytes * 3 // 4, 96 * 1024 * 1024),
            ),
        )(x_nct, w)

    try:
        # v7x: shard the batch axis across both TensorCores (per-core VMEM
        # carry scratch; every batch element still starts at t == 0).
        return run(pltpu.CORE_PARALLEL)
    except Exception:
        # Single-TensorCore chips / toolchains rejecting CORE_PARALLEL.
        return run(pltpu.PARALLEL)


def _reference(x_nct, weight):
    """Pure-JAX reference matching the PyTorch forward exactly (f32)."""
    N, Cin, T = x_nct.shape
    x_pad = jnp.pad(x_nct, ((0, 0), (0, 0), (1, 0)))
    return (jnp.einsum("oi,nit->not", weight[:, :, 0], x_pad[:, :, :T])
            + jnp.einsum("oi,nit->not", weight[:, :, 1], x_pad[:, :, 1:T + 1]))


def _run_case(key, *, N, Cin, Cout, T, dtype, t_tile, atol):
    kx, kw = jax.random.split(key)
    x = jax.random.normal(kx, (N, Cin, T), dtype=jnp.float32)
    # PyTorch Conv1d default init: U(-k, k), k = 1/sqrt(Cin * kernel_size)
    bound = 1.0 / math.sqrt(Cin * 2)
    weight = jax.random.uniform(kw, (Cout, Cin, 2), dtype=jnp.float32,
                                minval=-bound, maxval=bound)
    x_d = x.astype(dtype)
    w_d = weight.astype(dtype)

    y = causal_conv1d(x_d, w_d, t_tile=t_tile)
    y = jax.block_until_ready(y)
    assert y.shape == (N, Cout, T)
    assert y.dtype == dtype

    y_ref = _reference(x_d.astype(jnp.float32), w_d.astype(jnp.float32))
    err = float(jnp.max(jnp.abs(y.astype(jnp.float32) - y_ref)))
    assert err < atol, f"max|err|={err} exceeds atol={atol} for dtype={dtype}"


if __name__ == "__main__":
    key = jax.random.PRNGKey(0)
    k1, k2, k3 = jax.random.split(key, 3)

    # Small shapes matching the module; single (padded) time tile.
    _run_case(k1, N=2, Cin=4, Cout=8, T=16,
              dtype=jnp.float32, t_tile=None, atol=1e-4)
    # Multi-tile carry chain + ragged last tile (T=300 with 128-wide tiles).
    _run_case(k2, N=2, Cin=8, Cout=16, T=300,
              dtype=jnp.float32, t_tile=128, atol=1e-4)
    # bf16 I/O path (f32 accumulation), multi-tile carry chain.
    _run_case(k3, N=2, Cin=16, Cout=16, T=512,
              dtype=jnp.bfloat16, t_tile=256, atol=5e-2)

    print("KERNEL_OK")
</pallas_src>

<mosaic_0001>
module attributes {stable_mosaic.version = 11 : i64} {
  func.func @_causal_conv1d_kernel(%arg0: i32, %arg1: i32, %arg2: memref<1x4x128xf32, #tpu.memory_space<vmem>>, %arg3: memref<2x8x4xf32, #tpu.memory_space<vmem>>, %arg4: memref<1x8x128xf32, #tpu.memory_space<vmem>>, %arg5: memref<8x1xf32, #tpu.memory_space<vmem>>) attributes {dimension_semantics = [#tpu.dimension_semantics<core_parallel>, #tpu.dimension_semantics<arbitrary>], iteration_bounds = array<i64: 2, 1>, scalar_prefetch = 0 : i64, scratch_operands = 1 : i64, tpu.core_type = #tpu.core_type<tc>, window_params = [{transform_indices = @transform_0, window_bounds = array<i64: 1, 4, 128>}, {pipeline_mode = #tpu.pipeline_mode<synchronous>, transform_indices = @transform_1, window_bounds = array<i64: 2, 8, 4>}, {transform_indices = @transform_2, window_bounds = array<i64: 1, 8, 128>}]} {
    %c0_i32 = arith.constant 0 : i32
    %0 = arith.cmpi eq, %arg1, %c0_i32 : i32
    %1 = arith.extui %0 : i1 to i32
    %c0_i32_0 = arith.constant 0 : i32
    %2 = arith.cmpi ne, %1, %c0_i32_0 : i32
    scf.if %2 {
      %cst_19 = arith.constant 0.000000e+00 : f32
      %24 = vector.broadcast %cst_19 : f32 to vector<8x1xf32>
      %c0_20 = arith.constant 0 : index
      %c0_21 = arith.constant 0 : index
      %25 = vector.load %arg5[%c0_20, %c0_21] : memref<8x1xf32, #tpu.memory_space<vmem>>, vector<8x1xf32>
      tpu.vector_store %arg5[%c0_20, %c0_21], %24 {strides = array<i32>} : memref<8x1xf32, #tpu.memory_space<vmem>>, vector<8x1xf32>,
    } else {
    }
    %c0 = arith.constant 0 : index
    %c0_1 = arith.constant 0 : index
    %c0_2 = arith.constant 0 : index
    %3 = vector.load %arg2[%c0, %c0_1, %c0_2] : memref<1x4x128xf32, #tpu.memory_space<vmem>>, vector<1x4x128xf32>
    %4 = vector.shape_cast %3 : vector<1x4x128xf32> to vector<4x128xf32>
    %c0_3 = arith.constant 0 : index
    %c0_4 = arith.constant 0 : index
    %c0_5 = arith.constant 0 : index
    %5 = vector.load %arg3[%c0_3, %c0_4, %c0_5] : memref<2x8x4xf32, #tpu.memory_space<vmem>>, vector<1x8x4xf32>
    %6 = vector.shape_cast %5 : vector<1x8x4xf32> to vector<8x4xf32>
    %cst = arith.constant dense<0.000000e+00> : vector<8x128xf32>
    %7 = tpu.matmul %6, %4, %cst {dimension_numbers = #tpu.dot_dimension_numbers<[1], [0], [0], [1], [0, 0, 1, 1], [], []>} : vector<8x4xf32>, vector<4x128xf32>, vector<8x128xf32> -> vector<8x128xf32>
    %c1 = arith.constant 1 : index
    %c0_6 = arith.constant 0 : index
    %c0_7 = arith.constant 0 : index
    %8 = vector.load %arg3[%c1, %c0_6, %c0_7] : memref<2x8x4xf32, #tpu.memory_space<vmem>>, vector<1x8x4xf32>
    %9 = vector.shape_cast %8 : vector<1x8x4xf32> to vector<8x4xf32>
    %cst_8 = arith.constant dense<0.000000e+00> : vector<8x128xf32>
    %10 = tpu.matmul %9, %4, %cst_8 {dimension_numbers = #tpu.dot_dimension_numbers<[1], [0], [0], [1], [0, 0, 1, 1], [], []>} : vector<8x4xf32>, vector<4x128xf32>, vector<8x128xf32> -> vector<8x128xf32>
    %c0_9 = arith.constant 0 : index
    %c0_10 = arith.constant 0 : index
    %11 = vector.load %arg5[%c0_9, %c0_10] : memref<8x1xf32, #tpu.memory_space<vmem>>, vector<8x1xf32>
    %12 = vector.extract_strided_slice %7 {offsets = [0, 127], sizes = [8, 1], strides = [1, 1]} : vector<8x128xf32> to vector<8x1xf32>
    %c0_11 = arith.constant 0 : index
    %c0_12 = arith.constant 0 : index
    %13 = vector.load %arg5[%c0_11, %c0_12] : memref<8x1xf32, #tpu.memory_space<vmem>>, vector<8x1xf32>
    tpu.vector_store %arg5[%c0_11, %c0_12], %12 {strides = array<i32>} : memref<8x1xf32, #tpu.memory_space<vmem>>, vector<8x1xf32>,
    %c1_i32 = arith.constant 1 : i32
    %14 = tpu.dynamic_rotate %7 by %c1_i32 dim 1 : vector<8x128xf32>, i32 -> vector<8x128xf32>
    %15 = arith.addf %10, %14 : vector<8x128xf32>
    %c0_13 = arith.constant 0 : index
    %c0_14 = arith.constant 0 : index
    %c0_15 = arith.constant 0 : index
    %16 = vector.load %arg4[%c0_13, %c0_14, %c0_15] : memref<1x8x128xf32, #tpu.memory_space<vmem>>, vector<1x8x128xf32>
    %17 = vector.shape_cast %16 : vector<1x8x128xf32> to vector<8x128xf32>
    %18 = vector.shape_cast %15 : vector<8x128xf32> to vector<1x8x128xf32>
    tpu.vector_store %arg4[%c0_13, %c0_14, %c0_15], %18 {strides = array<i32>} : memref<1x8x128xf32, #tpu.memory_space<vmem>>, vector<1x8x128xf32>,
    %19 = vector.extract_strided_slice %10 {offsets = [0, 0], sizes = [8, 1], strides = [1, 1]} : vector<8x128xf32> to vector<8x1xf32>
    %20 = arith.addf %19, %11 : vector<8x1xf32>
    %c0_16 = arith.constant 0 : index
    %c0_17 = arith.constant 0 : index
    %c0_18 = arith.constant 0 : index
    %21 = vector.load %arg4[%c0_16, %c0_17, %c0_18] : memref<1x8x128xf32, #tpu.memory_space<vmem>>, vector<1x8x1xf32>
    %22 = vector.shape_cast %21 : vector<1x8x1xf32> to vector<8x1xf32>
    %23 = vector.shape_cast %20 : vector<8x1xf32> to vector<1x8x1xf32>
    tpu.vector_store %arg4[%c0_16, %c0_17, %c0_18], %23 {strides = array<i32>} : memref<1x8x128xf32, #tpu.memory_space<vmem>>, vector<1x8x1xf32>,
    return
  }
  func.func @transform_0(%arg0: i32, %arg1: i32) -> (i32, i32, i32) {
    %c0_i32 = arith.constant 0 : i32
    %c0_i32_0 = arith.constant 0 : i32
    return %arg0, %c0_i32, %arg1 : i32, i32, i32
  }
  func.func @transform_1(%arg0: i32, %arg1: i32) -> (i32, i32, i32) {
    %c0_i32 = arith.constant 0 : i32
    %c0_i32_0 = arith.constant 0 : i32
    %c0_i32_1 = arith.constant 0 : i32
    %c0_i32_2 = arith.constant 0 : i32
    return %c0_i32, %c0_i32_0, %c0_i32_1 : i32, i32, i32
  }
  func.func @transform_2(%arg0: i32, %arg1: i32) -> (i32, i32, i32) {
    %c0_i32 = arith.constant 0 : i32
    %c0_i32_0 = arith.constant 0 : i32
    return %arg0, %c0_i32, %arg1 : i32, i32, i32
  }
}

module attributes {stable_mosaic.version = 11 : i64} {
  func.func @_causal_conv1d_kernel(%arg0: i32, %arg1: i32, %arg2: memref<1x4x128xf32, #tpu.memory_space<vmem>>, %arg3: memref<2x8x4xf32, #tpu.memory_space<vmem>>, %arg4: memref<1x8x128xf32, #tpu.memory_space<vmem>>, %arg5: memref<8x1xf32, #tpu.memory_space<vmem>>) attributes {dimension_semantics = [#tpu.dimension_semantics<parallel>, #tpu.dimension_semantics<arbitrary>], iteration_bounds = array<i64: 2, 1>, scalar_prefetch = 0 : i64, scratch_operands = 1 : i64, tpu.core_type = #tpu.core_type<tc>, window_params = [{transform_indices = @transform_0, window_bounds = array<i64: 1, 4, 128>}, {pipeline_mode = #tpu.pipeline_mode<synchronous>, transform_indices = @transform_1, window_bounds = array<i64: 2, 8, 4>}, {transform_indices = @transform_2, window_bounds = array<i64: 1, 8, 128>}]} {
    %c0_i32 = arith.constant 0 : i32
    %0 = arith.cmpi eq, %arg1, %c0_i32 : i32
    %1 = arith.extui %0 : i1 to i32
    %c0_i32_0 = arith.constant 0 : i32
    %2 = arith.cmpi ne, %1, %c0_i32_0 : i32
    scf.if %2 {
      %cst_19 = arith.constant 0.000000e+00 : f32
      %24 = vector.broadcast %cst_19 : f32 to vector<8x1xf32>
      %c0_20 = arith.constant 0 : index
      %c0_21 = arith.constant 0 : index
      %25 = vector.load %arg5[%c0_20, %c0_21] : memref<8x1xf32, #tpu.memory_space<vmem>>, vector<8x1xf32>
      tpu.vector_store %arg5[%c0_20, %c0_21], %24 {strides = array<i32>} : memref<8x1xf32, #tpu.memory_space<vmem>>, vector<8x1xf32>,
    } else {
    }
    %c0 = arith.constant 0 : index
    %c0_1 = arith.constant 0 : index
    %c0_2 = arith.constant 0 : index
    %3 = vector.load %arg2[%c0, %c0_1, %c0_2] : memref<1x4x128xf32, #tpu.memory_space<vmem>>, vector<1x4x128xf32>
    %4 = vector.shape_cast %3 : vector<1x4x128xf32> to vector<4x128xf32>
    %c0_3 = arith.constant 0 : index
    %c0_4 = arith.constant 0 : index
    %c0_5 = arith.constant 0 : index
    %5 = vector.load %arg3[%c0_3, %c0_4, %c0_5] : memref<2x8x4xf32, #tpu.memory_space<vmem>>, vector<1x8x4xf32>
    %6 = vector.shape_cast %5 : vector<1x8x4xf32> to vector<8x4xf32>
    %cst = arith.constant dense<0.000000e+00> : vector<8x128xf32>
    %7 = tpu.matmul %6, %4, %cst {dimension_numbers = #tpu.dot_dimension_numbers<[1], [0], [0], [1], [0, 0, 1, 1], [], []>} : vector<8x4xf32>, vector<4x128xf32>, vector<8x128xf32> -> vector<8x128xf32>
    %c1 = arith.constant 1 : index
    %c0_6 = arith.constant 0 : index
    %c0_7 = arith.constant 0 : index
    %8 = vector.load %arg3[%c1, %c0_6, %c0_7] : memref<2x8x4xf32, #tpu.memory_space<vmem>>, vector<1x8x4xf32>
    %9 = vector.shape_cast %8 : vector<1x8x4xf32> to vector<8x4xf32>
    %cst_8 = arith.constant dense<0.000000e+00> : vector<8x128xf32>
    %10 = tpu.matmul %9, %4, %cst_8 {dimension_numbers = #tpu.dot_dimension_numbers<[1], [0], [0], [1], [0, 0, 1, 1], [], []>} : vector<8x4xf32>, vector<4x128xf32>, vector<8x128xf32> -> vector<8x128xf32>
    %c0_9 = arith.constant 0 : index
    %c0_10 = arith.constant 0 : index
    %11 = vector.load %arg5[%c0_9, %c0_10] : memref<8x1xf32, #tpu.memory_space<vmem>>, vector<8x1xf32>
    %12 = vector.extract_strided_slice %7 {offsets = [0, 127], sizes = [8, 1], strides = [1, 1]} : vector<8x128xf32> to vector<8x1xf32>
    %c0_11 = arith.constant 0 : index
    %c0_12 = arith.constant 0 : index
    %13 = vector.load %arg5[%c0_11, %c0_12] : memref<8x1xf32, #tpu.memory_space<vmem>>, vector<8x1xf32>
    tpu.vector_store %arg5[%c0_11, %c0_12], %12 {strides = array<i32>} : memref<8x1xf32, #tpu.memory_space<vmem>>, vector<8x1xf32>,
    %c1_i32 = arith.constant 1 : i32
    %14 = tpu.dynamic_rotate %7 by %c1_i32 dim 1 : vector<8x128xf32>, i32 -> vector<8x128xf32>
    %15 = arith.addf %10, %14 : vector<8x128xf32>
    %c0_13 = arith.constant 0 : index
    %c0_14 = arith.constant 0 : index
    %c0_15 = arith.constant 0 : index
    %16 = vector.load %arg4[%c0_13, %c0_14, %c0_15] : memref<1x8x128xf32, #tpu.memory_space<vmem>>, vector<1x8x128xf32>
    %17 = vector.shape_cast %16 : vector<1x8x128xf32> to vector<8x128xf32>
    %18 = vector.shape_cast %15 : vector<8x128xf32> to vector<1x8x128xf32>
    tpu.vector_store %arg4[%c0_13, %c0_14, %c0_15], %18 {strides = array<i32>} : memref<1x8x128xf32, #tpu.memory_space<vmem>>, vector<1x8x128xf32>,
    %19 = vector.extract_strided_slice %10 {offsets = [0, 0], sizes = [8, 1], strides = [1, 1]} : vector<8x128xf32> to vector<8x1xf32>
    %20 = arith.addf %19, %11 : vector<8x1xf32>
    %c0_16 = arith.constant 0 : index
    %c0_17 = arith.constant 0 : index
    %c0_18 = arith.constant 0 : index
    %21 = vector.load %arg4[%c0_16, %c0_17, %c0_18] : memref<1x8x128xf32, #tpu.memory_space<vmem>>, vector<1x8x1xf32>
    %22 = vector.shape_cast %21 : vector<1x8x1xf32> to vector<8x1xf32>
    %23 = vector.shape_cast %20 : vector<8x1xf32> to vector<1x8x1xf32>
    tpu.vector_store %arg4[%c0_16, %c0_17, %c0_18], %23 {strides = array<i32>} : memref<1x8x128xf32, #tpu.memory_space<vmem>>, vector<1x8x1xf32>,
    return
  }
  func.func @transform_0(%arg0: i32, %arg1: i32) -> (i32, i32, i32) {
    %c0_i32 = arith.constant 0 : i32
    %c0_i32_0 = arith.constant 0 : i32
    return %arg0, %c0_i32, %arg1 : i32, i32, i32
  }
  func.func @transform_1(%arg0: i32, %arg1: i32) -> (i32, i32, i32) {
    %c0_i32 = arith.constant 0 : i32
    %c0_i32_0 = arith.constant 0 : i32
    %c0_i32_1 = arith.constant 0 : i32
    %c0_i32_2 = arith.constant 0 : i32
    return %c0_i32, %c0_i32_0, %c0_i32_1 : i32, i32, i32
  }
  func.func @transform_2(%arg0: i32, %arg1: i32) -> (i32, i32, i32) {
    %c0_i32 = arith.constant 0 : i32
    %c0_i32_0 = arith.constant 0 : i32
    return %arg0, %c0_i32, %arg1 : i32, i32, i32
  }
}

</mosaic_0001>

<bundles_post_ra>
// kernel: tpu_custom_call.1
= control target key start
LH: loop header
LB: loop body
LE: loop exit
PB: predicated region body
PF: predicated region fallthrough
CT: control target
= control target key end

     0   :  { %7 = vsyncpa [#allocation4], 0  ;;  %s602_s0 = inlined_call_operand.vmem [shape: f32[2,4,16], index: 0, kind: input, shape index: {}]   ;;  %s603_s1 = inlined_call_operand.vmem [shape: f32[2,8,4], index: 1, kind: input, shape index: {}]   ;;  %s604_s2 = inlined_call_operand.hbm [shape: f32[2,8,16], index: 2, kind: output, shape index: {}]  }
   0x1   :  { %9 = vsyncpa [#allocation4 + $0x1], 0  ;;  %s496_s9 = smov 0   ;;  %s498_s10 = smov 0  }
   0x2   :  { %s500_s11 = smov 0   ;;  %s502_s12 = smov 0  }
   0x3   :  { %s504_s13 = smov 0   ;;  %s506_s14 = smov 0  }
   0x4 LB: > { %s326_s15 = sadd.s32 4294967295, %s477_s14   ;;  %s327_s16 = sadd.s32 4294967294, %s477_s14   ;;  %s477_s14 = sphi %s506_s14, %s15_s14   ;;  %s473_s13 = sphi %s504_s13, %s611_s13   ;;  %s469_s12 = sphi %s502_s12, %s610_s12   ;;  %s465_s11 = sphi %s500_s11, %s609_s11   ;;  %s461_s10 = sphi %s498_s10, %s608_s10   ;;  %s457_s9 = sphi %s496_s9, %s607_s9  }
   0x5   : > { %s27_s17 = sadd.s32 1, %s473_s13  ;;  %s85_s18 = sadd.s32 1, %s465_s11 }
   0x6   : > { %p29_p0 = scmp.ge.s32.totalorder %s27_s17, 2  ;;  %p95_p1 = scmp.ne.s32.totalorder %s465_s11, %s461_s10 }
   0x7   : > { %p96_p2 = scmp.eq.s32.totalorder %s326_s15, 1  ;;  %p101_p3 = scmp.ne.s32.totalorder %s461_s10, %s457_s9 }
   0x8   : > { %s613_s17 = smov (%p29_p0, %s27_s17), 0  ;;  %p102_p5 = scmp.eq.s32.totalorder %s327_s16, 1 }
   0x9   : > { %p536_p4 = por %p96_p2, %p95_p1  ;;  %s80_s20 = ssub.s32 %s473_s13, %s613_s17 }
   0xa   : > { %p330_p6 = scmp.ge.s32.totalorder %s477_s14, 1  ;;  %p83_p7 = scmp.eq.s32.totalorder %s80_s20, 0 }
   0xb   : > { %p543_p8 = por %p102_p5, %p101_p3  ;;  %p133_p9 = scmp.lt.s32.totalorder %s477_s14, 3 }
   0xc   : > { %s549_s22 = scalar_select %p83_p7, %s465_s11, %s85_s18  }
   0xd   : > { %p134_p10 = pnand %p330_p6, %p133_p9 }
   0xe   : > { %p157_p11 = scmp.lt.s32.totalorder (!%p134_p10), %s469_s12, 1  ;;  %s480_s4 = smov (!%p134_p10), 1  }
   0xf   : > { %137 = sbr.rel (%p134_p10) target bundleno = 276 (0x114), region = 28  ;;  %s154_s5 = sand.u32 (!%p134_p10), 1, %s461_s10  }
  0x10   : > { %s339_s6 = sshll.u32 (!%p134_p10), %s469_s12, 3  ;;  %s331_s7 = sshll.u32 (!%p134_p10), %s154_s5, 3 }
  0x11   : > { %s250_s16 = scalar_lea.hbm (!%p134_p10), %s604_s2, %s339_s6  ;;  %s156_s18 = scalar_lea.vmem (!%p134_p10), [#allocation3], %s331_s7 }
  0x12   : > { %s252_s20 = sshll.u32 (!%p134_p10), %s156_s18, 4  ;;  %s419_s28 = scalar_lea.hbm (!%p134_p10), %s604_s2, 16  ;;  %s253_s20 = int_to_ptr.vmem [resolvable:$true] %s252_s20 }
  0x14   : > { %s158_s23 = scalar_select %p157_p11, %s469_s12, 1  ;;  %vm176_vm0 = vcmask 1043456   ;;  %v171_v0 = vld [vmem:[%s603_s1] sm:$0xff]  ;;  %vm172_vm1 = vcmask 31744   ;;  %v335_v1 = vld [vmem:[%s603_s1 + $0x8] sm:$0xff]  ;;  %vm168_vm2 = vcmask 7168  }
  0x15   : > { %v479_v3 = vmov 0.0   ;;  %s239_s12 = scalar_lea.sflag [#allocation4], %s154_s5 }
  0x16   : > { %s332_s24 = sshll.u32 %s158_s23, 2  ;;  %169 = vst.msk [vmem:[#allocation2] sm:$0xff] %vm168_vm2, %v479_v3  ;;  %s254_s23 = sshll.u32 %s250_s16, 4  ;;  %s255_s23 = int_to_ptr.hbm [resolvable:$true] %s254_s23 }
  0x17   : > { %s163_s27 = scalar_lea.vmem %s602_s0, %s332_s24  ;;  %s413_s24 = sshra.s32 %s255_s23, 4  ;;  %s414_s24 = int_to_ptr.hbm [resolvable:$true] %s413_s24 }
  0x18   : > { %v170_v2 = vld [vmem:[%s163_s27] sm:$0xf]  ;;  %s415_s25 = scalar_lea.hbm %s414_s24, 8  ;;  %p420_p1 = scmp.lt.s32.totalorder %s414_s24, %s604_s2 }
  0x19   : > { %333 = vmatpush.msk.msra.mxu0 %vm176_vm0, %v170_v2  ;;  %336 = vmatpush.msk.msra.mxu1 %vm176_vm0, %v170_v2  ;;  %p416_p12 = scmp.ne.s32.totalorder %s414_s24, %s415_s25  ;;  %p421_p2 = scmp.lt.s32.totalorder %s419_s28, %s415_s25 }
  0x1a   : > { %334 = vmatmul.msk.f32.vlgmr.msra.gmra.mxu0 %vm172_vm1, %v171_v0  ;;  %337 = vmatmul.msk.f32.vlgmr.msra.gmra.mxu1 %vm172_vm1, %v335_v1 }
  0x1b   : > { %p417_p13 = pnand %p416_p12, %p536_p4  ;;  %p422_p3 = por %p421_p2, %p420_p1 }
  0x1d   : > { %v225_v5 = vld [vmem:[#allocation2] sm:$0xff]  ;;  %p418_p0 = pneg %p417_p13 }
  0x1f   : > { %p423_p5 = pnand %p422_p3, %p418_p0 }
  0x97   : > { %v197_v4 = vpop.f32.mrf.mxu0  ;;  %v222_v6 = vpop.f32.mrf.mxu1 }
  0x98   : > { %232 = vrot.lane.b32.xlu0 %v197_v4, %s480_s4  ;;  %v236_v7 = vadd.f32 %v225_v5, %v222_v6 }
  0xa0   : > { %227 = vrot.lane.b32.xlu0 %v197_v4, %s480_s4 }
 0x10a   : > { %v233_v8 = vpop.permute.xlu0 %232 }
 0x10b   : > { %v234_v9 = vadd.f32 %v233_v8, %v222_v6 }
 0x10d   : > { %235 = vst [vmem:[%s156_s18] sm:$0xff] %v234_v9 }
 0x10e   : > { %237 = vst.msk [vmem:[%s156_s18] sm:$0xff] %vm168_vm2, %v236_v7 }
 0x10f   : > { %426 = shalt.err (!%p423_p5)
}
 0x110   : > { %342 = dma.vmem_to_hbm [thread:$0]  (%p536_p4), %s253_s20, 128, %s255_s23, %s239_s12  }
 0x112   : > { %v228_v10 = vpop.permute.xlu0 %227 }
 0x113   : > { %231 = vst.msk [vmem:[#allocation2] sm:$0xff] %vm168_vm2, %v228_v10 }
 0x114 PF: > { %p348_p6 = scmp.ge.s32.totalorder %s477_s14, 2  ;;  %s266_s3 = sand.u32 1, %s457_s9  }
 0x115   : > { %s267_s4 = scalar_lea.sflag [#allocation4], %s266_s3 }
 0x116   : > { %p345_p7 = pnand %p348_p6, %p543_p8 }
 0x118   : > { %p346_p9 = pneg %p345_p7 }
 0x11a   : > { %452 = dma.done.wait (%p346_p9), %s267_s4, 128  }
 0x11b   : > { %454 = vsyncadd (%p346_p9), %s267_s4, 4294967168  ;;  %s15_s14 = sadd.s32 1, %s477_s14   ;;  %s607_s9 = smov %s461_s10 }
 0x11c   : > { %p12_p10 = scmp.ge.s32.totalorder %s15_s14, 4   ;;  %s608_s10 = smov %s465_s11 }
 0x11d   : > { %s609_s11 = smov %s549_s22  ;;  %s610_s12 = smov %s473_s13 }
 0x11e   : > { %s611_s13 = smov %s613_s17  ;;  %14 = sbr.rel (!%p12_p10) target bundleno = 4 (0x4), region = 68 }
 0x123   :  { %273 = vsyncpa [#allocation4], 1 }
 0x124   :  { %275 = vsyncpa [#allocation4 + $0x1], 1 }

</bundles_post_ra>
